<compile_context>
chip_gen: v6e
topology: v6e:2x2x1
jax: 0.10.0
libtpu: 0.0.40
codegen_flags: <defaults>
</compile_context>

<pallas_src>
import functools
import math

import jax
import jax.numpy as jnp
from jax.experimental import pallas as pl
from jax.experimental.pallas import tpu as pltpu

LANES = 128
MAX_TILE_R = 2048  # (2048, 128) f32 tile = 1 MiB per input per pipeline buffer


def _ceil_div(a, b):
    return -(-a // b)


def _round_up(a, b):
    return _ceil_div(a, b) * b


def _sublane_multiple(dtype):
    # 8 rows for 4-byte dtypes, 16 for 2-byte (bf16/f16), 32 for 1-byte.
    return 8 * max(1, 4 // jnp.dtype(dtype).itemsize)


def _wbce_partial_kernel(x_ref, t_ref, o_ref, *, pos_weight, neg_weight, tile_r):
    # Cast the VMEM-resident tiles (native dtype on the wire) to f32 on-chip.
    x = x_ref[...].astype(jnp.float32)
    t = t_ref[...].astype(jnp.float32)

    # Unweighted per-class log terms; weights/negation applied once per
    # (8,128) partial below (hoists 2 vector multiplies + a negate per element).
    term_pos = t * jnp.log(x)
    term_neg = (1.0 - t) * jnp.log1p(-x)

    # Collapse (tile_r, 128) -> (8, 128): sublane-tile-aligned reshape + adds
    # over the leading axis (pure VPU work, no cross-lane XLU reduce in-kernel).
    s_pos = term_pos.reshape(tile_r // 8, 8, LANES).sum(axis=0)
    s_neg = term_neg.reshape(tile_r // 8, 8, LANES).sum(axis=0)

    # One dense, unmasked (8,128) vreg store per grid step.
    o_ref[...] = -(pos_weight * s_pos + neg_weight * s_neg)


def weighted_bce_loss(inp, target, pos_weight=1.0, neg_weight=1.0):
    """Mean weighted BCE loss over all elements. inp/target: same shape."""
    assert inp.shape == target.shape
    total_n = math.prod(inp.shape)
    assert total_n > 0

    pos_w = float(pos_weight)
    neg_w = float(neg_weight)

    # Stream native dtypes (no f32 upcast in the wrapper).
    x = inp.reshape(-1)
    t = target.reshape(-1)
    sub = max(_sublane_multiple(x.dtype), _sublane_multiple(t.dtype))

    rows = _ceil_div(total_n, LANES)
    # v7x has 2 TensorCores: never collapse a non-trivial input to grid=(1,).
    min_blocks = 2 if rows >= 2 * sub else 1
    num_blocks = max(min_blocks, _ceil_div(rows, MAX_TILE_R))
    tile_r = _round_up(_ceil_div(rows, num_blocks), sub)
    num_blocks = max(1, _ceil_div(rows, tile_r))
    rows_padded = num_blocks * tile_r
    padded_n = rows_padded * LANES
    pad = padded_n - total_n

    if pad:
        # Constant pad value 0.5 (exact in every float dtype); its contribution
        # is removed analytically below -- no in-kernel mask, no extra copy of
        # the real data beyond the pad itself.
        x = jnp.pad(x, (0, pad), constant_values=0.5)
        t = jnp.pad(t, (0, pad), constant_values=0.5)

    x2 = x.reshape(rows_padded, LANES)
    t2 = t.reshape(rows_padded, LANES)

    kernel = functools.partial(
        _wbce_partial_kernel,
        pos_weight=pos_w,
        neg_weight=neg_w,
        tile_r=tile_r,
    )

    partials = pl.pallas_call(
        kernel,
        out_shape=jax.ShapeDtypeStruct((num_blocks * 8, LANES), jnp.float32),
        grid_spec=pltpu.PrefetchScalarGridSpec(
            num_scalar_prefetch=0,
            grid=(num_blocks,),
            in_specs=[
                pl.BlockSpec((tile_r, LANES), lambda i: (i, 0)),
                pl.BlockSpec((tile_r, LANES), lambda i: (i, 0)),
            ],
            out_specs=pl.BlockSpec((8, LANES), lambda i: (i, 0)),
        ),
        compiler_params=pltpu.CompilerParams(
            dimension_semantics=("parallel",),  # independent blocks: both TCs on v7x
            vmem_limit_bytes=32 * 1024 * 1024,
        ),
    )(x2, t2)

    # Tiny final reduction + pad correction + mean scaling in the wrapper (XLA).
    total = jnp.sum(partials, dtype=jnp.float32)
    if pad:
        # Each pad element (x = t = 0.5) contributed exactly
        # -(pos_w*0.5 + neg_w*0.5) * log(0.5); subtract it.
        pad_per_elem = -0.5 * (pos_w + neg_w) * math.log(0.5)
        total = total - jnp.float32(pad * pad_per_elem)
    return total / jnp.float32(total_n)


if __name__ == "__main__":
    key = jax.random.PRNGKey(0)
    k1, k2, k3, k4 = jax.random.split(key, 4)

    B, C, H, W = 2, 4, 16, 16  # NCHW, matching PyTorch conv-style input
    pos_w, neg_w = 2.0, 0.5

    # --- f32 inputs (probabilities in (0,1); 0/1 targets) -------------------
    x = jax.nn.sigmoid(jax.random.normal(k1, (B, C, H, W), dtype=jnp.float32))
    x = jnp.clip(x, 1e-6, 1.0 - 1e-6)
    t = (jax.random.uniform(k2, (B, C, H, W)) > 0.5).astype(jnp.float32)

    loss = jax.block_until_ready(weighted_bce_loss(x, t, pos_w, neg_w))
    ref = jnp.mean(-pos_w * t * jnp.log(x) - neg_w * (1.0 - t) * jnp.log1p(-x))
    assert jnp.allclose(loss, ref, rtol=1e-5, atol=1e-6), (loss, ref)

    # --- ragged shape: exercises analytic pad correction (mask-free kernel) --
    xr = jax.nn.sigmoid(jax.random.normal(k3, (3, 5, 7, 11), dtype=jnp.float32))
    xr = jnp.clip(xr, 1e-6, 1.0 - 1e-6)
    tr = (jax.random.uniform(k4, (3, 5, 7, 11)) > 0.5).astype(jnp.float32)
    loss_r = jax.block_until_ready(weighted_bce_loss(xr, tr, pos_w, neg_w))
    ref_r = jnp.mean(-pos_w * tr * jnp.log(xr) - neg_w * (1.0 - tr) * jnp.log1p(-xr))
    assert jnp.allclose(loss_r, ref_r, rtol=1e-5, atol=1e-6), (loss_r, ref_r)

    # --- bf16 inputs stream natively (half the HBM bytes); math still f32 ----
    xb = x.astype(jnp.bfloat16)
    tb = t.astype(jnp.bfloat16)
    loss_b = jax.block_until_ready(weighted_bce_loss(xb, tb, pos_w, neg_w))
    xbf = xb.astype(jnp.float32)
    tbf = tb.astype(jnp.float32)
    ref_b = jnp.mean(-pos_w * tbf * jnp.log(xbf)
                     - neg_w * (1.0 - tbf) * jnp.log1p(-xbf))
    assert jnp.allclose(loss_b, ref_b, rtol=1e-5, atol=1e-5), (loss_b, ref_b)

    print("KERNEL_OK")
</pallas_src>

<mosaic_0001>
module attributes {stable_mosaic.version = 11 : i64} {
  func.func @_wbce_partial_kernel(%arg0: i32, %arg1: memref<8x128xf32, #tpu.memory_space<vmem>>, %arg2: memref<8x128xf32, #tpu.memory_space<vmem>>, %arg3: memref<8x128xf32, #tpu.memory_space<vmem>>) attributes {dimension_semantics = [#tpu.dimension_semantics<parallel>], iteration_bounds = array<i64: 2>, scalar_prefetch = 0 : i64, scratch_operands = 0 : i64, tpu.core_type = #tpu.core_type<tc>, window_params = [{transform_indices = @transform_0, window_bounds = array<i64: 8, 128>}, {transform_indices = @transform_1, window_bounds = array<i64: 8, 128>}, {transform_indices = @transform_2, window_bounds = array<i64: 8, 128>}]} {
    %c0 = arith.constant 0 : index
    %c0_0 = arith.constant 0 : index
    %0 = vector.load %arg1[%c0, %c0_0] : memref<8x128xf32, #tpu.memory_space<vmem>>, vector<8x128xf32>
    %c0_1 = arith.constant 0 : index
    %c0_2 = arith.constant 0 : index
    %1 = vector.load %arg2[%c0_1, %c0_2] : memref<8x128xf32, #tpu.memory_space<vmem>>, vector<8x128xf32>
    %2 = math.log %0 : vector<8x128xf32>
    %3 = arith.mulf %1, %2 : vector<8x128xf32>
    %cst = arith.constant 1.000000e+00 : f32
    %4 = vector.broadcast %cst : f32 to vector<8x128xf32>
    %5 = arith.subf %4, %1 : vector<8x128xf32>
    %cst_3 = arith.constant 0.000000e+00 : f32
    %6 = vector.broadcast %cst_3 : f32 to vector<8x128xf32>
    %7 = arith.subf %6, %0 : vector<8x128xf32>
    %8 = math.log1p %7 : vector<8x128xf32>
    %9 = arith.mulf %5, %8 : vector<8x128xf32>
    %10 = vector.shape_cast %3 : vector<8x128xf32> to vector<1x8x128xf32>
    %cst_4 = arith.constant dense<0.000000e+00> : vector<8x128xf32>
    %11 = vector.multi_reduction <add>, %10, %cst_4 [0] : vector<1x8x128xf32> to vector<8x128xf32>
    %12 = vector.shape_cast %9 : vector<8x128xf32> to vector<1x8x128xf32>
    %cst_5 = arith.constant dense<0.000000e+00> : vector<8x128xf32>
    %13 = vector.multi_reduction <add>, %12, %cst_5 [0] : vector<1x8x128xf32> to vector<8x128xf32>
    %cst_6 = arith.constant 2.000000e+00 : f32
    %14 = vector.broadcast %cst_6 : f32 to vector<8x128xf32>
    %15 = arith.mulf %14, %11 : vector<8x128xf32>
    %cst_7 = arith.constant 5.000000e-01 : f32
    %16 = vector.broadcast %cst_7 : f32 to vector<8x128xf32>
    %17 = arith.mulf %16, %13 : vector<8x128xf32>
    %18 = arith.addf %15, %17 : vector<8x128xf32>
    %cst_8 = arith.constant 0.000000e+00 : f32
    %19 = vector.broadcast %cst_8 : f32 to vector<8x128xf32>
    %20 = arith.subf %19, %18 : vector<8x128xf32>
    %c0_9 = arith.constant 0 : index
    %c0_10 = arith.constant 0 : index
    %21 = vector.load %arg3[%c0_9, %c0_10] : memref<8x128xf32, #tpu.memory_space<vmem>>, vector<8x128xf32>
    tpu.vector_store %arg3[%c0_9, %c0_10], %20 {strides = array<i32>} : memref<8x128xf32, #tpu.memory_space<vmem>>, vector<8x128xf32>,
    return
  }
  func.func @transform_0(%arg0: i32) -> (i32, i32) {
    %c0_i32 = arith.constant 0 : i32
    %c0_i32_0 = arith.constant 0 : i32
    return %arg0, %c0_i32 : i32, i32
  }
  func.func @transform_1(%arg0: i32) -> (i32, i32) {
    %c0_i32 = arith.constant 0 : i32
    %c0_i32_0 = arith.constant 0 : i32
    return %arg0, %c0_i32 : i32, i32
  }
  func.func @transform_2(%arg0: i32) -> (i32, i32) {
    %c0_i32 = arith.constant 0 : i32
    %c0_i32_0 = arith.constant 0 : i32
    return %arg0, %c0_i32 : i32, i32
  }
}

</mosaic_0001>

<bundles_post_ra>
// kernel: tpu_custom_call.1
= control target key start
LH: loop header
LB: loop body
LE: loop exit
PB: predicated region body
PF: predicated region fallthrough
CT: control target
= control target key end

     0   :  { %7 = vsyncpa [#allocation3], 0  ;;  %s740_s0 = inlined_call_operand.hbm [shape: f32[16,128], index: 0, kind: input, shape index: {}]   ;;  %s741_s1 = inlined_call_operand.hbm [shape: f32[16,128], index: 1, kind: input, shape index: {}]   ;;  %s742_s2 = inlined_call_operand.hbm [shape: f32[16,128], index: 2, kind: output, shape index: {}]  }
   0x1   :  { %9 = vsyncpa [#allocation3 + $0x1], 0 }
   0x2   :  { %10 = vsyncpa [#allocation6], 0 }
   0x3   :  { %12 = vsyncpa [#allocation6 + $0x1], 0 }
   0x4   :  { %13 = vsyncpa [#allocation4], 0 }
   0x5   :  { %15 = vsyncpa [#allocation4 + $0x1], 0  ;;  %s541_s9 = smov 0   ;;  %s543_s10 = smov 0  }
   0x6   :  { %s545_s11 = smov 0   ;;  %s547_s12 = smov 0  }
   0x7 LB: > { %s562_s13 = sadd.s32 4294967295, %s521_s12   ;;  %s327_s14 = sadd.s32 4294967294, %s521_s12   ;;  %s521_s12 = sphi %s547_s12, %s761_s12   ;;  %s517_s11 = sphi %s545_s11, %s760_s11   ;;  %s513_s10 = sphi %s543_s10, %s759_s10   ;;  %s509_s9 = sphi %s541_s9, %s758_s9  }
   0x8   : > { %s566_s15 = sadd.s32 1, %s521_s12   ;;  %s28_s16 = sadd.s32 1, %s517_s11 }
   0x9   : > { %s25_s17 = ssub.s32 %s521_s12, %s566_s15  ;;  %p35_p0 = scmp.ne.s32.totalorder %s517_s11, %s513_s10 }
   0xa   : > { %p26_p1 = scmp.eq.s32.totalorder %s25_s17, 0  ;;  %p36_p2 = scmp.eq.s32.totalorder %s521_s12, 0 }
   0xb   : > { %p41_p3 = scmp.ne.s32.totalorder %s513_s10, %s509_s9  ;;  %p42_p4 = scmp.eq.s32.totalorder %s562_s13, 0 }
   0xc   : > { %s578_s18 = scalar_select %p26_p1, %s517_s11, %s28_s16  }
   0xd   : > { %p580_p5 = por %p36_p2, %p35_p0  ;;  %p584_p6 = por %p42_p4, %p41_p3 }
   0xe   : > { %p91_p7 = scmp.eq.s32.totalorder %s562_s13, 1  ;;  %p97_p8 = scmp.eq.s32.totalorder %s327_s14, 1 }
   0xf   : > { %s746_s20 = scalar_select %p584_p6, 1, 0 }
  0x10   : > { %p359_p10 = scmp.lt.s32.totalorder %s521_s12, 2  ;;  %p591_p11 = por %p91_p7, %p35_p0 }
  0x11   : > { %p595_p12 = por %p97_p8, %p41_p3  ;;  %s600_s23 = sand.u32 1, %s517_s11  }
  0x12   : > { %s747_s21 = scalar_select %p591_p11, 1, 0 }
  0x13   : > { %s748_s22 = scalar_select %p595_p12, 1, 0 }
  0x14   : > { %s331_s24 = sshll.u32 %s521_s12, 7  ;;  %s330_s25 = sshll.u32 %s600_s23, 3 }
  0x15   : > { %s609_s28 = scalar_lea.hbm %s740_s0, %s331_s24  ;;  %s121_s29 = scalar_lea.vmem [#allocation2], %s330_s25 }
  0x16   : > { %s128_s30 = sshll.u32 %s121_s29, 4  ;;  %p615_p13 = pnand %p359_p10, %p580_p5  ;;  %s619_s30 = int_to_ptr.vmem [resolvable:$true] %s128_s30 }
  0x17   : > { %s118_s4 = scalar_lea.sflag [#allocation3], %s600_s23  ;;  %s397_s5 = scalar_lea.hbm %s609_s28, 128 }
  0x18   : > { %p398_p2 = scmp.ne.s32.totalorder %s609_s28, %s397_s5  ;;  %p399_p3 = pneg %p615_p13 }
  0x19   : > { %s402_s8 = scalar_lea.hbm %s740_s0, 256  ;;  %p403_p5 = scmp.lt.s32.totalorder %s609_s28, %s740_s0 }
  0x1a   : > { %p400_p4 = pnand %p399_p3, %p398_p2  ;;  %p404_p8 = scmp.lt.s32.totalorder %s402_s8, %s397_s5 }
  0x1c   : > { %p401_p7 = pneg %p400_p4  ;;  %p405_p10 = por %p404_p8, %p403_p5 }
  0x1e   : > { %p406_p9 = pnand %p405_p10, %p401_p7 }
  0x20   : > { %409 = shalt.err (!%p406_p9)
}
  0x21   : > { %s410_s17 = scalar_lea.vmem %s619_s30, 128  ;;  %s523_s19 = smov [#allocation2]  }
  0x22   : > { %p411_p0 = scmp.ne.s32.totalorder %s619_s30, %s410_s17  ;;  %s415_s26 = sshll.u32 %s523_s19, 4  ;;  %s416_s26 = int_to_ptr.vmem [resolvable:$false] %s415_s26 }
  0x23   : > { %s417_s27 = scalar_lea.vmem %s416_s26, 256  ;;  %p418_p1 = scmp.lt.s32.totalorder %s619_s30, %s416_s26 }
  0x24   : > { %p413_p2 = pnand %p411_p0, %p399_p3  ;;  %p419_p12 = scmp.lt.s32.totalorder %s417_s27, %s410_s17 }
  0x26   : > { %p414_p4 = pneg %p413_p2  ;;  %p420_p11 = por %p419_p12, %p418_p1 }
  0x28   : > { %p421_p5 = pnand %p420_p11, %p414_p4 }
  0x2a   : > { %424 = shalt.err (!%p421_p5)
}
  0x2b   : > { %351 = dma.hbm_to_vmem [thread:$0]  (!%p615_p13), %s609_s28, 128, %s619_s30, %s118_s4  }
  0x2c   : > { %p750_p9 = scmp.lt.s32.totalorder %s521_s12, 3  ;;  %p751_p0 = scmp.ge.s32.totalorder %s521_s12, 1 }
  0x2d   : > { %s661_s7 = scalar_lea.hbm %s741_s1, %s331_s24  ;;  %s139_s8 = scalar_lea.vmem [#allocation5], %s330_s25 }
  0x2e   : > { %p652_p7 = pnand %p751_p0, %p750_p9  ;;  %s146_s14 = sshll.u32 %s139_s8, 4  ;;  %s147_s14 = int_to_ptr.vmem [resolvable:$true] %s146_s14 }
  0x2f   : > { %s136_s28 = scalar_lea.sflag [#allocation6], %s600_s23  ;;  %s425_s30 = scalar_lea.hbm %s661_s7, 128 }
  0x30   : > { %s752_s29 = scalar_select %p652_p7, 1, 0 }
  0x31   : > { %p426_p11 = scmp.ne.s32.totalorder %s661_s7, %s425_s30  ;;  %s430_s17 = scalar_lea.hbm %s741_s1, 256 }
  0x32   : > { %p431_p8 = scmp.lt.s32.totalorder %s661_s7, %s741_s1  ;;  %p432_p10 = scmp.lt.s32.totalorder %s430_s17, %s425_s30 }
  0x33   : > { %p428_p12 = pnand %p426_p11, %p399_p3 }
  0x34   : > { %p433_p2 = por %p432_p10, %p431_p8 }
  0x35   : > { %p429_p1 = pneg %p428_p12 }
  0x37   : > { %p434_p4 = pnand %p433_p2, %p429_p1 }
  0x39   : > { %437 = shalt.err (!%p434_p4)
}
  0x3a   : > { %s438_s25 = scalar_lea.vmem %s147_s14, 128  ;;  %s524_s23 = smov [#allocation5]  }
  0x3b   : > { %p439_p5 = scmp.ne.s32.totalorder %s147_s14, %s438_s25  ;;  %s443_s26 = sshll.u32 %s524_s23, 4  ;;  %s444_s26 = int_to_ptr.vmem [resolvable:$false] %s443_s26 }
  0x3c   : > { %s445_s27 = scalar_lea.vmem %s444_s26, 256  ;;  %p446_p11 = scmp.lt.s32.totalorder %s147_s14, %s444_s26 }
  0x3d   : > { %p441_p9 = pnand %p439_p5, %p399_p3  ;;  %p447_p12 = scmp.lt.s32.totalorder %s445_s27, %s438_s25 }
  0x3f   : > { %p442_p0 = pneg %p441_p9  ;;  %p448_p6 = por %p447_p12, %p446_p11 }
  0x41   : > { %p449_p7 = pnand %p448_p6, %p442_p0 }
  0x43   : > { %452 = shalt.err (!%p449_p7)
}
  0x44   : > { %354 = dma.hbm_to_vmem [thread:$0]  (!%p615_p13), %s661_s7, 128, %s147_s14, %s136_s28  }
  0x45   : > { %p753_p1 = scmp.ne.s32.totalorder %s752_s29, 0 }
  0x46   : > { %s687_s5 = sand.u32 (!%p753_p1), 1, %s513_s10   ;;  %p754_p6 = scmp.ne.s32.totalorder (!%p753_p1), %s746_s20, 0 }
  0x47   : > { %155 = sbr.rel (%p753_p1) target bundleno = 122 (0x7a), region = 28  ;;  %s690_s6 = sshll.u32 (!%p753_p1), %s687_s5, 3 }
  0x48   : > { %s158_s8 = scalar_lea.sflag (!%p753_p1), [#allocation3], %s687_s5  ;;  %s161_s30 = scalar_lea.vmem (!%p753_p1), [#allocation2], %s690_s6 }
  0x4c   : > { %496 = dma.done.wait (%p754_p6), %s158_s8, 128  }
  0x4d   : > { %498 = vsyncadd (%p754_p6), %s158_s8, 4294967168  ;;  %s167_s3 = scalar_lea.sflag [#allocation6], %s687_s5  ;;  %s170_s29 = scalar_lea.vmem [#allocation5], %s690_s6 }
  0x4e   : > { %500 = dma.done.wait (%p754_p6), %s167_s3, 128  }
  0x4f   : > { %502 = vsyncadd (%p754_p6), %s167_s3, 4294967168  ;;  %v196_v0 = vld [vmem:[%s161_s30] sm:$0xff]  ;;  %v197_v7 = vld [vmem:[%s170_s29] sm:$0xff]  ;;  %s195_s20 = scalar_lea.vmem [#allocation7], %s690_s6  ;;  %s339_s14 = sshll.u32 %s562_s13, 7 }
  0x50   : > { %393 = vlog2.f32 %v196_v0  ;;  %v202_v1 = vsub.f32 0.0, %v196_v0  ;;  %v201_v12 = vsub.f32 1.0, %v197_v7  ;;  %s234_s7 = sshll.u32 %s195_s20, 4  ;;  %s232_s16 = scalar_lea.hbm %s742_s2, %s339_s14  ;;  %s235_s7 = int_to_ptr.vmem [resolvable:$true] %s234_s7 }
  0x51   : > { %s221_s17 = scalar_lea.sflag [#allocation4], %s687_s5  ;;  %s453_s24 = scalar_lea.vmem %s235_s7, 128 }
  0x52   : > { %v203_v2 = vadd.f32 1.0, %v202_v1  ;;  %v206_v3 = vmul.f32 -0.5, %v202_v1  ;;  %v209_v6 = vand.u32 2147483647, %v202_v1  ;;  %p454_p13 = scmp.ne.s32.totalorder %s235_s7, %s453_s24  ;;  %p755_p3 = scmp.ne.s32.totalorder %s747_s21, 0 }
  0x53   : > { %s525_s19 = smov [#allocation7]  }
  0x54   : > { %395 = vlog2.f32 %v203_v2  ;;  %v207_v4 = vadd.f32 1.0, %v206_v3  ;;  %vm210_vm0 = vcmp.lt.f32.partialorder %v209_v6, 0.0004427343  ;;  %p455_p7 = pnand %p454_p13, %p755_p3  ;;  %s457_s25 = sshll.u32 %s525_s19, 4  ;;  %s458_s25 = int_to_ptr.vmem [resolvable:$false] %s457_s25 }
  0x55   : > { %s459_s23 = scalar_lea.vmem %s458_s25, 256  ;;  %p460_p10 = scmp.lt.s32.totalorder %s235_s7, %s458_s25 }
  0x56   : > { %v208_v9 = vmul.f32 %v207_v4, %v202_v1  ;;  %p456_p8 = pneg %p455_p7  ;;  %p461_p2 = scmp.lt.s32.totalorder %s459_s23, %s453_s24 }
  0x58   : > { %p462_p4 = por %p461_p2, %p460_p10 }
  0x5a   : > { %p463_p5 = pnand %p462_p4, %p456_p8 }
  0x5d   : > { %v394_v5 = vpop.eup %393 }
  0x5e   : > { %v199_v8 = vmul.f32 0.6931472, %v394_v5 }
  0x60   : > { %v200_v11 = vmul.f32 %v199_v8, %v197_v7 }
  0x61   : > { %v396_v10 = vpop.eup %395 }
  0x62   : > { %v205_v13 = vmul.f32 0.6931472, %v396_v10  ;;  %v215_v16 = vmul.f32 2.0, %v200_v11 }
  0x64   : > { %v211_v14 = vsel %vm210_vm0, %v208_v9, %v205_v13 }
  0x65   : > { %v212_v15 = vmul.f32 %v211_v14, %v201_v12 }
  0x67   : > { %v216_v17 = vmul.f32 0.5, %v212_v15 }
  0x69   : > { %v217_v18 = vadd.f32 %v216_v17, %v215_v16 }
  0x6b   : > { %v218_v19 = vsub.f32 0.0, %v217_v18 }
  0x6d   : > { %219 = vst [vmem:[%s195_s20] sm:$0xff] %v218_v19 }
  0x6e   : > { %466 = shalt.err (!%p463_p5)
}
  0x6f   : > { %s467_s13 = scalar_lea.hbm %s232_s16, 128  ;;  %s471_s5 = scalar_lea.hbm %s742_s2, 256 }
  0x70   : > { %p468_p9 = scmp.ne.s32.totalorder %s232_s16, %s467_s13  ;;  %p472_p12 = scmp.lt.s32.totalorder %s232_s16, %s742_s2 }
  0x71   : > { %p473_p1 = scmp.lt.s32.totalorder %s471_s5, %s467_s13 }
  0x72   : > { %p469_p0 = pnand %p468_p9, %p755_p3 }
  0x73   : > { %p474_p6 = por %p473_p1, %p472_p12 }
  0x74   : > { %p470_p11 = pneg %p469_p0 }
  0x76   : > { %p475_p13 = pnand %p474_p6, %p470_p11 }
  0x78   : > { %478 = shalt.err (!%p475_p13)
}
  0x79   : > { %346 = dma.vmem_to_hbm [thread:$0]  (%p755_p3), %s235_s7, 128, %s232_s16, %s221_s17  }
  0x7a PF: > { %s246_s30 = sand.u32 1, %s509_s9   ;;  %p756_p7 = scmp.ne.s32.totalorder %s748_s22, 0 }
  0x7b   : > { %p757_p8 = scmp.ge.s32.totalorder %s521_s12, 2  ;;  %s247_s3 = scalar_lea.sflag [#allocation4], %s246_s30 }
  0x7d   : > { %p356_p10 = pnand %p757_p8, %p756_p7 }
  0x7f   : > { %p357_p2 = pneg %p356_p10 }
  0x81   : > { %504 = dma.done.wait (%p357_p2), %s247_s3, 128  }
  0x82   : > { %506 = vsyncadd (%p357_p2), %s247_s3, 4294967168  ;;  %p18_p4 = scmp.ge.s32.totalorder %s566_s15, 4   ;;  %s758_s9 = smov %s513_s10 }
  0x83   : > { %s759_s10 = smov %s517_s11  ;;  %s760_s11 = smov %s578_s18 }
  0x84   : > { %s761_s12 = smov %s566_s15  ;;  %20 = sbr.rel (!%p18_p4) target bundleno = 7 (0x7), region = 86 }
  0x89   :  { %252 = vsyncpa [#allocation3], 1 }
  0x8a   :  { %254 = vsyncpa [#allocation3 + $0x1], 1 }
  0x8b   :  { %255 = vsyncpa [#allocation6], 1 }
  0x8c   :  { %257 = vsyncpa [#allocation6 + $0x1], 1 }
  0x8d   :  { %258 = vsyncpa [#allocation4], 1 }
  0x8e   :  { %260 = vsyncpa [#allocation4 + $0x1], 1 }

</bundles_post_ra>
